<compile_context>
chip_gen: v7x
topology: tpu7x:2x2x1
jax: 0.10.0
libtpu: 0.0.40
codegen_flags: <defaults>
</compile_context>

<pallas_src>
import math

import jax
import jax.numpy as jnp
from jax.experimental import pallas as pl
from jax.experimental.pallas import tpu as pltpu

_MASK = -1e30        # "no edge" logit; bf16-representable, exp() underflows to 0
_NEG_SLOPE = 0.2     # PyG GATConv default negative_slope


def _round_up(x, m):
    return ((x + m - 1) // m) * m


# ---------------------------------------------------------------------------
# Kernel 1: node feature transform  h = x @ W   (the GATConv `lin`)
#   f32 inputs, f32 MXU accumulation, bf16 output (halves h's HBM/VMEM cost).
# ---------------------------------------------------------------------------
def _node_transform_kernel(x_ref, w_ref, h_ref):
    h_ref[...] = jnp.dot(
        x_ref[...], w_ref[...], preferred_element_type=jnp.float32
    ).astype(h_ref.dtype)


def node_transform(x, w, *, tm):
    n, f_in = x.shape
    hc = w.shape[1]
    return pl.pallas_call(
        _node_transform_kernel,
        out_shape=jax.ShapeDtypeStruct((n, hc), jnp.bfloat16),
        grid_spec=pltpu.PrefetchScalarGridSpec(
            num_scalar_prefetch=0,
            grid=(n // tm,),
            in_specs=[
                pl.BlockSpec((tm, f_in), lambda i: (i, 0)),   # node tile
                pl.BlockSpec((f_in, hc), lambda i: (0, 0)),   # weight (resident)
            ],
            out_specs=pl.BlockSpec((tm, hc), lambda i: (i, 0)),
        ),
        compiler_params=pltpu.CompilerParams(
            dimension_semantics=("parallel",)),
        cost_estimate=pl.CostEstimate(
            flops=2 * n * f_in * hc,
            transcendentals=0,
            bytes_accessed=4 * n * f_in + 4 * f_in * hc + 2 * n * hc),
    )(x, w)


# ---------------------------------------------------------------------------
# Kernel 2: fused attention + aggregation for a tile of destination nodes.
#   logits[i, j] = a_dst[i] + a_src[j] + edge_bias[i, j]   (edge j -> i)
#   p = exp(LeakyReLU(logits) - rowmax);  out = (p @ h) * 1/rowsum + bias
# ---------------------------------------------------------------------------
def _gat_attention_kernel(h_ref, asrc_ref, adst_ref, eb_ref, b_ref, o_ref):
    # Logit math in f32; the O(N^2) edge-bias stream arrives in bf16.
    logits = adst_ref[...] + asrc_ref[...] + eb_ref[...].astype(jnp.float32)
    logits = jnp.where(logits >= 0, logits, _NEG_SLOPE * logits)

    # Masked row-softmax with DEFERRED normalization: scale the (TM, HC)
    # aggregation result instead of dividing the (TM, N) probability matrix.
    m = jnp.max(logits, axis=-1, keepdims=True)
    p = jnp.exp(logits - m)
    denom = jnp.sum(p, axis=-1, keepdims=True)

    out = jnp.dot(p.astype(h_ref.dtype), h_ref[...],        # bf16 x bf16 on MXU
                  preferred_element_type=jnp.float32)
    out = out * pl.reciprocal(denom, approx=True)           # EUP, ~free slot
    o_ref[...] = (out + b_ref[...]).astype(o_ref.dtype)


def gat_attention(h, a_src_row, a_dst_col, edge_bias, bias, *, tm,
                  out_dtype=jnp.float32):
    n_pad, hc = h.shape
    # Explicit VMEM budget (double-buffered streams + f32 temporaries), capped
    # at 64 MiB so the same tiling also fits one v7x TensorCore.
    vmem_bytes = (
        2 * n_pad * hc * 2        # resident h (bf16, double-buffered)
        + 2 * tm * n_pad * 2      # edge-bias tiles (bf16, double-buffered)
        + 4 * tm * n_pad * 4      # f32 logits / exp temporaries
        + 2 * tm * hc * 4         # output tiles
        + 4 * (n_pad + tm + hc)   # small vectors
    )
    vmem_limit = int(min(64 * 1024 * 1024,
                         max(2 * vmem_bytes, 32 * 1024 * 1024)))
    return pl.pallas_call(
        _gat_attention_kernel,
        out_shape=jax.ShapeDtypeStruct((n_pad, hc), out_dtype),
        grid_spec=pltpu.PrefetchScalarGridSpec(
            num_scalar_prefetch=0,
            grid=(n_pad // tm,),
            in_specs=[
                pl.BlockSpec((n_pad, hc), lambda i: (0, 0)),   # full h (resident, bf16)
                pl.BlockSpec((1, n_pad), lambda i: (0, 0)),    # a_src row (resident)
                pl.BlockSpec((tm, 1), lambda i: (i, 0)),       # a_dst tile
                pl.BlockSpec((tm, n_pad), lambda i: (i, 0)),   # edge-bias tile (bf16)
                pl.BlockSpec((1, hc), lambda i: (0, 0)),       # output bias (resident)
            ],
            out_specs=pl.BlockSpec((tm, hc), lambda i: (i, 0)),
        ),
        compiler_params=pltpu.CompilerParams(
            dimension_semantics=("parallel",),
            vmem_limit_bytes=vmem_limit),
        cost_estimate=pl.CostEstimate(
            flops=2 * n_pad * n_pad * hc + 6 * n_pad * n_pad + 2 * n_pad * hc,
            transcendentals=n_pad * n_pad + n_pad,
            bytes_accessed=(2 * n_pad * n_pad + 2 * n_pad * hc
                            + 4 * n_pad * hc + 8 * n_pad + 4 * hc)),
    )(h, a_src_row, a_dst_col, edge_bias, bias)


# ---------------------------------------------------------------------------
# Glue: graph preprocessing (data-dependent scatter; no clean Pallas equivalent)
# ---------------------------------------------------------------------------
def _add_self_loops(edge_index, edge_attr, num_nodes):
    # PyG GATConv default: add_self_loops=True, fill_value='mean' (per-node
    # mean of incoming edge_attr). Assumes the input edge list has no
    # self-loops and no duplicate edges.
    dst = edge_index[1]
    e = edge_attr.shape[0]
    deg = jax.ops.segment_sum(jnp.ones((e,), edge_attr.dtype), dst,
                              num_segments=num_nodes)
    loop_attr = jax.ops.segment_sum(edge_attr, dst, num_segments=num_nodes)
    loop_attr = loop_attr / jnp.maximum(deg, 1.0)[:, None]
    loop = jnp.arange(num_nodes, dtype=edge_index.dtype)
    ei = jnp.concatenate([edge_index, jnp.stack([loop, loop])], axis=1)
    ea = jnp.concatenate([edge_attr, loop_attr], axis=0)
    return ei, ea


def gat_forward(params, x, edge_index, edge_attr, *, tm=128):
    """GATProcessor.forward: one GATConv (heads=1, dropout=0.0 -> no-op)."""
    assert tm % 8 == 0
    n = x.shape[0]
    hc = params["w_node"].shape[1]

    ei, ea = _add_self_loops(edge_index, edge_attr, n)

    # Pad node count so tiles are lane-dense and fully defined.
    n_pad = _round_up(n, math.lcm(tm, 128))
    x_pad = jnp.zeros((n_pad, x.shape[1]), x.dtype).at[:n].set(x)

    # Per-edge attention contribution (att_edge folded into W_edge at init).
    alpha_e = (ea @ params["v_edge"])[:, 0]                        # (E + N,)

    # Dense bf16 attention-bias matrix: edge_bias[i, j] = alpha_e for edge
    # j -> i, else _MASK (softmax weight underflows to exactly 0).
    # TODO(synk): duplicate edges overwrite instead of adding separate softmax
    # terms like PyG's segment softmax; assumes a de-duplicated edge list.
    # TODO(synk): for genuinely sparse graphs, a scalar-prefetched per-block
    # "has-any-edge" skip over source blocks (flash-style online softmax) would
    # avoid the O(N^2) work entirely; dense formulation kept here.
    edge_bias = jnp.full((n_pad, n_pad), _MASK, dtype=jnp.bfloat16)
    edge_bias = edge_bias.at[ei[1], ei[0]].set(alpha_e.astype(jnp.bfloat16))

    # a_src / a_dst are identical for every destination tile -> compute once
    # here from the init-time folded vectors (x @ (W @ att^T)), in f32.
    a_src_row = (x_pad @ params["v_src"]).astype(jnp.float32).T    # (1, n_pad)
    a_dst_col = (x_pad @ params["v_dst"]).astype(jnp.float32)      # (n_pad, 1)

    h = node_transform(x_pad, params["w_node"], tm=tm)             # Pallas, bf16
    out = gat_attention(h, a_src_row, a_dst_col, edge_bias,        # Pallas
                        params["bias"], tm=tm, out_dtype=x.dtype)
    return out[:n]


def init_params(key, in_channels, out_channels, edge_dim, heads=1):
    # TODO(synk): heads > 1 needs per-head packing into the lane dimension;
    # the module default (heads=1) is what this kernel implements.
    assert heads == 1
    hc = heads * out_channels
    ks = jax.random.split(key, 5)

    def u(k, shape, fan_in):
        b = 1.0 / (fan_in ** 0.5)
        return jax.random.uniform(k, shape, jnp.float32, minval=-b, maxval=b)

    w_node = u(ks[0], (in_channels, hc), in_channels)  # (in, out): no per-call transpose
    w_edge = u(ks[1], (edge_dim, hc), edge_dim)
    att_src = u(ks[2], (1, hc), hc)
    att_dst = u(ks[3], (1, hc), hc)
    att_edge = u(ks[4], (1, hc), hc)
    bias = jnp.zeros((1, hc), jnp.float32)             # PyG GATConv zero-inits bias
    return {
        "w_node": w_node, "w_edge": w_edge,
        "att_src": att_src, "att_dst": att_dst, "att_edge": att_edge,
        "bias": bias,
        # Attention vectors only ever contract with their weight matrix ->
        # fold once at init (no per-call repacking / per-tile matmuls).
        "v_edge": w_edge @ att_edge.T,   # (edge_dim, 1)
        "v_src": w_node @ att_src.T,     # (in_channels, 1)
        "v_dst": w_node @ att_dst.T,     # (in_channels, 1)
    }


# ---------------------------------------------------------------------------
# Pure-JAX f32 per-edge reference (segment softmax), for correctness checking.
# ---------------------------------------------------------------------------
def gat_ref(params, x, edge_index, edge_attr, negative_slope=_NEG_SLOPE):
    n = x.shape[0]
    ei, ea = _add_self_loops(edge_index, edge_attr, n)
    src, dst = ei[0], ei[1]
    h = x @ params["w_node"]
    he = ea @ params["w_edge"]
    a_src = (h * params["att_src"]).sum(-1)
    a_dst = (h * params["att_dst"]).sum(-1)
    a_edge = (he * params["att_edge"]).sum(-1)
    alpha = a_src[src] + a_dst[dst] + a_edge
    alpha = jnp.where(alpha >= 0, alpha, negative_slope * alpha)
    amax = jax.ops.segment_max(alpha, dst, num_segments=n)
    p = jnp.exp(alpha - amax[dst])
    denom = jax.ops.segment_sum(p, dst, num_segments=n)
    attn = p / denom[dst]
    out = jax.ops.segment_sum(h[src] * attn[:, None], dst, num_segments=n)
    return out + params["bias"]


if __name__ == "__main__":
    key = jax.random.PRNGKey(0)
    k_x, k_e, k_p = jax.random.split(key, 3)

    N = 200              # nodes (not a multiple of 128 -> exercises padding)
    IN_CHANNELS = 32
    OUT_CHANNELS = 128   # lane-dense output (multiple of 128)
    EDGE_DIM = 16
    HEADS = 1
    TM = 128             # node tile -> n_pad = 256, grid = (2,)

    x = jax.random.normal(k_x, (N, IN_CHANNELS), jnp.float32)

    # Deterministic edge list: i -> (i+k) mod N for k in {1, 2, 3}
    # (no self-loops, no duplicate edges). Row 0 = source, row 1 = target.
    base = jnp.arange(N, dtype=jnp.int32)
    src = jnp.concatenate([base, base, base])
    dst = jnp.concatenate([(base + 1) % N, (base + 2) % N, (base + 3) % N])
    edge_index = jnp.stack([src, dst])
    edge_attr = jax.random.normal(k_e, (src.shape[0], EDGE_DIM), jnp.float32)

    params = init_params(k_p, IN_CHANNELS, OUT_CHANNELS, EDGE_DIM, heads=HEADS)

    out = gat_forward(params, x, edge_index, edge_attr, tm=TM)
    out = jax.block_until_ready(out)

    ref = gat_ref(params, x, edge_index, edge_attr)
    assert out.shape == (N, HEADS * OUT_CHANNELS)
    # bf16 h / edge-bias / probability MXU operands + approx reciprocal vs a
    # pure-f32 per-edge reference -> modest tolerance.
    assert jnp.allclose(out, ref, atol=2e-2, rtol=2e-2), "mismatch vs reference"

    print("KERNEL_OK")
</pallas_src>

<mosaic_0001>
module attributes {stable_mosaic.version = 11 : i64} {
  func.func @_node_transform_kernel(%arg0: i32, %arg1: memref<128x32xf32, #tpu.memory_space<vmem>>, %arg2: memref<32x128xf32, #tpu.memory_space<vmem>>, %arg3: memref<128x128xbf16, #tpu.memory_space<vmem>>) attributes {dimension_semantics = [#tpu.dimension_semantics<parallel>], iteration_bounds = array<i64: 2>, scalar_prefetch = 0 : i64, scratch_operands = 0 : i64, tpu.core_type = #tpu.core_type<tc>, window_params = [{transform_indices = @transform_0, window_bounds = array<i64: 128, 32>}, {pipeline_mode = #tpu.pipeline_mode<synchronous>, transform_indices = @transform_1, window_bounds = array<i64: 32, 128>}, {transform_indices = @transform_2, window_bounds = array<i64: 128, 128>}]} {
    %c0 = arith.constant 0 : index
    %c0_0 = arith.constant 0 : index
    %0 = vector.load %arg1[%c0, %c0_0] : memref<128x32xf32, #tpu.memory_space<vmem>>, vector<128x32xf32>
    %c0_1 = arith.constant 0 : index
    %c0_2 = arith.constant 0 : index
    %1 = vector.load %arg2[%c0_1, %c0_2] : memref<32x128xf32, #tpu.memory_space<vmem>>, vector<32x128xf32>
    %cst = arith.constant dense<0.000000e+00> : vector<128x128xf32>
    %2 = tpu.matmul %0, %1, %cst {dimension_numbers = #tpu.dot_dimension_numbers<[1], [0], [0], [1], [0, 0, 1, 1], [], []>} : vector<128x32xf32>, vector<32x128xf32>, vector<128x128xf32> -> vector<128x128xf32>
    %3 = arith.truncf %2 : vector<128x128xf32> to vector<128x128xbf16>
    %c0_3 = arith.constant 0 : index
    %c0_4 = arith.constant 0 : index
    %4 = vector.load %arg3[%c0_3, %c0_4] : memref<128x128xbf16, #tpu.memory_space<vmem>>, vector<128x128xbf16>
    tpu.vector_store %arg3[%c0_3, %c0_4], %3 {strides = array<i32>} : memref<128x128xbf16, #tpu.memory_space<vmem>>, vector<128x128xbf16>,
    return
  }
  func.func @transform_0(%arg0: i32) -> (i32, i32) {
    %c0_i32 = arith.constant 0 : i32
    %c0_i32_0 = arith.constant 0 : i32
    return %arg0, %c0_i32 : i32, i32
  }
  func.func @transform_1(%arg0: i32) -> (i32, i32) {
    %c0_i32 = arith.constant 0 : i32
    %c0_i32_0 = arith.constant 0 : i32
    %c0_i32_1 = arith.constant 0 : i32
    return %c0_i32, %c0_i32_0 : i32, i32
  }
  func.func @transform_2(%arg0: i32) -> (i32, i32) {
    %c0_i32 = arith.constant 0 : i32
    %c0_i32_0 = arith.constant 0 : i32
    return %arg0, %c0_i32 : i32, i32
  }
}

</mosaic_0001>

<bundles_post_ra>
// kernel: tpu_custom_call.1
= control target key start
LH: loop header
LB: loop body
LE: loop exit
PB: predicated region body
PF: predicated region fallthrough
CT: control target
= control target key end

     0   :  { %7 = vsyncpa [#allocation3], 0  ;;  %s962_s0 = inlined_call_operand.vmem [shape: f32[256,32], index: 0, kind: input, shape index: {}]   ;;  %s963_s1 = inlined_call_operand.vmem [shape: f32[32,128], index: 1, kind: input, shape index: {}]   ;;  %s964_s2 = inlined_call_operand.hbm [shape: bf16[256,128], index: 2, kind: output, shape index: {}]  }
   0x1   :  { %9 = vsyncpa [#allocation3 + $0x1], 0  ;;  %s810_s9 = smov 0   ;;  %s812_s10 = smov 0  }
   0x2   :  { %s814_s11 = smov 0   ;;  %s816_s12 = smov 0  }
   0x3 LB: > { %s831_s13 = sadd.s32 4294967295, %s790_s12   ;;  %s515_s14 = sadd.s32 4294967294, %s790_s12   ;;  %s790_s12 = sphi %s816_s12, %s970_s12   ;;  %s786_s11 = sphi %s814_s11, %s969_s11   ;;  %s782_s10 = sphi %s812_s10, %s968_s10   ;;  %s778_s9 = sphi %s810_s9, %s967_s9  }
   0x4   : > { %s835_s15 = sadd.s32 1, %s790_s12   ;;  %s69_s16 = sadd.s32 1, %s786_s11 }
   0x5   : > { %s66_s17 = ssub.s32 %s790_s12, %s835_s15  ;;  %p79_p0 = scmp.ne.s32.totalorder %s786_s11, %s782_s10 }
   0x6   : > { %p67_p1 = scmp.eq.s32.totalorder %s66_s17, 0  ;;  %p80_p2 = scmp.eq.s32.totalorder %s831_s13, 1 }
   0x7   : > { %p85_p3 = scmp.ne.s32.totalorder %s782_s10, %s778_s9  ;;  %p86_p4 = scmp.eq.s32.totalorder %s515_s14, 1 }
   0x8   : > { %s846_s18 = scalar_select %p67_p1, %s786_s11, %s69_s16  }
   0x9   : > { %p848_p5 = por %p80_p2, %p79_p0  ;;  %p852_p6 = por %p86_p4, %p85_p3 }
   0xa   : > { %p518_p7 = scmp.ge.s32.totalorder %s790_s12, 1  ;;  %p116_p8 = scmp.lt.s32.totalorder %s790_s12, 3 }
   0xc   : > { %p117_p9 = pnand %p518_p7, %p116_p8 }
   0xd   : > { %v161_v0 = vld [vmem:[%s963_s1] sm:$0xff] (!%p117_p9)  ;;  %v162_v1 = vld [vmem:[%s963_s1 + $0x8] sm:$0xff] (!%p117_p9)  ;;  %v163_v2 = vld [vmem:[%s963_s1 + $0x10] sm:$0xff] (!%p117_p9)  ;;  %s520_s27 = sshll.u32 (!%p117_p9), %s831_s13, 4  ;;  %vm165_vm0 = vcmask (!%p117_p9), 261120   ;;  %s135_s6 = sand.u32 (!%p117_p9), 1, %s782_s10  }
   0xe   : > { %120 = sbr.rel (%p117_p9) target bundleno = 269 (0x10d), region = 28  ;;  %v675_v3 = vpack.c.bf16 (!%p117_p9), %v162_v1, %v161_v0  ;;  %v164_v4 = vld [vmem:[%s963_s1 + $0x18] sm:$0xff] (!%p117_p9)  ;;  %p139_p10 = scmp.lt.s32.totalorder (!%p117_p9), %s520_s27, 31 }
   0xf   : > { %v679_v5 = vpack.c.bf16 (!%p117_p9), %v164_v4, %v163_v2  ;;  %s519_s7 = sshll.u32 (!%p117_p9), %s135_s6, 6  ;;  %s575_s14 = sshll.u32 (!%p117_p9), %s831_s13, 10 }
  0x10   : > { %676 = vmatprep.subr.bf16.mxu0 (!%p117_p9), %v675_v3  ;;  %683 = vmatprep.subr.bf16.mxu1 (!%p117_p9), %v675_v3  ;;  %s137_s8 = scalar_lea.vmem (!%p117_p9), [#allocation2], %s519_s7  ;;  %s915_s22 = scalar_lea.hbm (!%p117_p9), %s964_s2, %s575_s14 }
  0x11   : > { %678 = vmatpush3.bf16.msra.mxu0 (!%p117_p9), %v675_v3  ;;  %685 = vmatpush3.bf16.msra.mxu1 (!%p117_p9), %v675_v3  ;;  %s453_s16 = sshll.u32 (!%p117_p9), %s137_s8, 4  ;;  %s921_s13 = scalar_lea.sflag (!%p117_p9), [#allocation3], %s135_s6  ;;  %s917_s16 = int_to_ptr.vmem [resolvable:$true] %s453_s16 }
  0x12   : > { %680 = vmatprep.subr.bf16.mxu0 (!%p117_p9), %v679_v5  ;;  %684 = vmatprep.subr.bf16.mxu1 (!%p117_p9), %v679_v5  ;;  %s728_s23 = scalar_lea.vmem (!%p117_p9), %s917_s16, 1024  ;;  %s792_s24 = smov (!%p117_p9), [#allocation2]  }
  0x13   : > { %p729_p11 = scmp.ne.s32.totalorder (!%p117_p9), %s917_s16, %s728_s23  ;;  %s732_s25 = sshll.u32 (!%p117_p9), %s792_s24, 4  ;;  %s733_s25 = int_to_ptr.vmem [resolvable:$false] %s732_s25 }
  0x14   : > { %s734_s26 = scalar_lea.vmem (!%p117_p9), %s733_s25, 2048  ;;  %p735_p0 = scmp.lt.s32.totalorder (!%p117_p9), %s917_s16, %s733_s25 }
  0x15   : > { %s972_s27 = smov (!%p139_p10, %s520_s27), 31  ;;  %682 = vmatpush3.bf16.msra.mxu0 %v679_v5  ;;  %686 = vmatpush3.bf16.msra.mxu1 %v679_v5  ;;  %p730_p12 = pnand %p729_p11, %p848_p5 }
  0x16   : > { %s521_s30 = sshll.u32 %s972_s27, 3  ;;  %p736_p1 = scmp.lt.s32.totalorder %s734_s26, %s728_s23 }
  0x17   : > { %s874_s5 = scalar_lea.vmem %s962_s0, %s521_s30  ;;  %p731_p13 = pneg %p730_p12 }
  0x18   : > { %v145_v6 = vld [vmem:[%s874_s5] sm:$0xff]  ;;  %v146_v8 = vld [vmem:[%s874_s5 + $0x8] sm:$0xff]  ;;  %v147_v10 = vld [vmem:[%s874_s5 + $0x10] sm:$0xff]  ;;  %p737_p2 = por %p736_p1, %p735_p0 }
  0x19   : > { %v153_v7 = vld [vmem:[%s874_s5 + $0x40] sm:$0xff]  ;;  %v154_v9 = vld [vmem:[%s874_s5 + $0x48] sm:$0xff]  ;;  %651 = vmatprep.mubr.msk.f32.mxu0 %vm165_vm0, %v145_v6  ;;  %v155_v11 = vld [vmem:[%s874_s5 + $0x50] sm:$0xff] }
  0x1a   : > { %663 = vmatprep.mubr.msk.f32.mxu1 %vm165_vm0, %v153_v7  ;;  %652 = vmatmul.mubr.msk.f32.vlgmr.msra.gmra.mrb[0].mxu0 %vm165_vm0, %v146_v8  ;;  %v148_v12 = vld [vmem:[%s874_s5 + $0x18] sm:$0xff]  ;;  %v149_v14 = vld [vmem:[%s874_s5 + $0x20] sm:$0xff]  ;;  %v150_v16 = vld [vmem:[%s874_s5 + $0x28] sm:$0xff]  ;;  %p738_p3 = pnand %p737_p2, %p731_p13 }
  0x1b   : > { %664 = vmatmul.mubr.msk.f32.vlgmr.msra.gmra.mrb[0].mxu1 %vm165_vm0, %v154_v9  ;;  %654 = vmatprep.mubr.msk.f32.mxu0 %vm165_vm0, %v147_v10  ;;  %v156_v13 = vld [vmem:[%s874_s5 + $0x58] sm:$0xff]  ;;  %v157_v15 = vld [vmem:[%s874_s5 + $0x60] sm:$0xff]  ;;  %v158_v17 = vld [vmem:[%s874_s5 + $0x68] sm:$0xff] }
  0x1c   : > { %666 = vmatprep.mubr.msk.f32.mxu1 %vm165_vm0, %v155_v11  ;;  %v151_v18 = vld [vmem:[%s874_s5 + $0x30] sm:$0xff]  ;;  %v152_v20 = vld [vmem:[%s874_s5 + $0x38] sm:$0xff] }
  0x1d   : > { %v159_v19 = vld [vmem:[%s874_s5 + $0x70] sm:$0xff]  ;;  %v160_v21 = vld [vmem:[%s874_s5 + $0x78] sm:$0xff] }
  0x1e   : > { %655 = vmatmul.mubr.msk.f32.gmra.mrb[2].mxu0 %vm165_vm0, %v148_v12 }
  0x1f   : > { %667 = vmatmul.mubr.msk.f32.gmra.mrb[2].mxu1 %vm165_vm0, %v156_v13  ;;  %657 = vmatprep.mubr.msk.f32.mxu0 %vm165_vm0, %v149_v14 }
  0x20   : > { %669 = vmatprep.mubr.msk.f32.mxu1 %vm165_vm0, %v157_v15 }
  0x22   : > { %658 = vmatmul.mubr.msk.f32.gmra.mrb[4].mxu0 %vm165_vm0, %v150_v16 }
  0x23   : > { %670 = vmatmul.mubr.msk.f32.gmra.mrb[4].mxu1 %vm165_vm0, %v158_v17  ;;  %660 = vmatprep.mubr.msk.f32.mxu0 %vm165_vm0, %v151_v18 }
  0x24   : > { %672 = vmatprep.mubr.msk.f32.mxu1 %vm165_vm0, %v159_v19 }
  0x26   : > { %661 = vmatmul.mubr.msk.f32.gmra.mrb[6].mxu0 %vm165_vm0, %v152_v20 }
  0x27   : > { %673 = vmatmul.mubr.msk.f32.gmra.mrb[6].mxu1 %vm165_vm0, %v160_v21 }
  0xed   : > { %v653_v22 = vpop.f32.mrb[0].mxu0 }
  0xee   : > { %v665_v23 = vpop.f32.mrb[0].mxu1  ;;  %v280_v24 = vpop.f32.mrb[1].mxu0 }
  0xef   : > { %v320_v25 = vpop.f32.mrb[1].mxu1  ;;  %v579_v26 = vpack.c.bf16 %v653_v22, %v280_v24 }
  0xf0   : > { %v599_v27 = vpack.c.bf16 %v665_v23, %v320_v25 }
  0xf1   : > { %580 = vst [vmem:[%s137_s8] sm:$0xff] %v579_v26   ;;  %v656_v28 = vpop.f32.mrb[2].mxu0 }
  0xf2   : > { %619 = vst [vmem:[%s137_s8 + $0x20] sm:$0xff] %v599_v27   ;;  %v668_v29 = vpop.f32.mrb[2].mxu1  ;;  %v290_v30 = vpop.f32.mrb[3].mxu0 }
  0xf3   : > { %v330_v31 = vpop.f32.mrb[3].mxu1  ;;  %v584_v32 = vpack.c.bf16 %v656_v28, %v290_v30 }
  0xf4   : > { %v604_v33 = vpack.c.bf16 %v668_v29, %v330_v31 }
  0xf5   : > { %616 = vst [vmem:[%s137_s8 + $0x8] sm:$0xff] %v584_v32   ;;  %v659_v34 = vpop.f32.mrb[4].mxu0 }
  0xf6   : > { %620 = vst [vmem:[%s137_s8 + $0x28] sm:$0xff] %v604_v33   ;;  %v671_v35 = vpop.f32.mrb[4].mxu1  ;;  %v300_v36 = vpop.f32.mrb[5].mxu0 }
  0xf7   : > { %v340_v37 = vpop.f32.mrb[5].mxu1  ;;  %v589_v38 = vpack.c.bf16 %v659_v34, %v300_v36 }
  0xf8   : > { %v609_v39 = vpack.c.bf16 %v671_v35, %v340_v37 }
  0xf9   : > { %617 = vst [vmem:[%s137_s8 + $0x10] sm:$0xff] %v589_v38   ;;  %v662_v40 = vpop.f32.mrb[6].mxu0 }
  0xfa   : > { %621 = vst [vmem:[%s137_s8 + $0x30] sm:$0xff] %v609_v39   ;;  %v674_v41 = vpop.f32.mrb[6].mxu1  ;;  %v310_v42 = vpop.f32.mrb[7].mxu0 }
  0xfb   : > { %v350_v43 = vpop.f32.mrb[7].mxu1  ;;  %v594_v44 = vpack.c.bf16 %v662_v40, %v310_v42 }
  0xfc   : > { %v614_v45 = vpack.c.bf16 %v674_v41, %v350_v43 }
  0xfd   : > { %618 = vst [vmem:[%s137_s8 + $0x18] sm:$0xff] %v594_v44  }
  0xfe   : > { %622 = vst [vmem:[%s137_s8 + $0x38] sm:$0xff] %v614_v45  }
  0xff   : > { %741 = shalt.err (!%p738_p3)
}
 0x100   : > { %s742_s27 = scalar_lea.hbm %s915_s22, 1024  ;;  %s746_s30 = scalar_lea.hbm %s964_s2, 2048 }
 0x101   : > { %p743_p4 = scmp.ne.s32.totalorder %s915_s22, %s742_s27  ;;  %p747_p9 = scmp.lt.u32.totalorder %s915_s22, %s964_s2 }
 0x102   : > { %p748_p10 = scmp.lt.u32.totalorder %s746_s30, %s742_s27  ;;  %p750_p12 = scmp.lt.u32.totalorder %s742_s27, %s915_s22 }
 0x103   : > { %p744_p7 = pnand %p743_p4, %p848_p5 }
 0x104   : > { %p749_p11 = por %p748_p10, %p747_p9 }
 0x105   : > { %p745_p8 = pneg %p744_p7 }
 0x106   : > { %p751_p13 = por %p750_p12, %p749_p11 }
 0x108   : > { %p752_p0 = pnand %p751_p13, %p745_p8 }
 0x10a   : > { %755 = shalt.err (!%p752_p0)
}
 0x10b   : > { %s793_s5 = smov 64   ;;  %s794_s6 = smov 4  }
 0x10c   : > { %687 = dma.vmem_to_hbm [thread:$0]  (%p848_p5), %s917_s16, 1024, %s915_s22, %s921_s13, %s793_s5, %s793_s5, %s794_s6  }
 0x10d PF: > { %p693_p1 = scmp.ge.s32.totalorder %s790_s12, 2  ;;  %s468_s7 = sand.u32 1, %s778_s9  }
 0x10e   : > { %s469_s8 = scalar_lea.sflag [#allocation3], %s468_s7 }
 0x10f   : > { %p690_p2 = pnand %p693_p1, %p852_p6 }
 0x111   : > { %773 = dma.done.wait (!%p690_p2), %s469_s8, 1024  }
 0x112   : > { %775 = vsyncadd (!%p690_p2), %s469_s8, 4294966272  ;;  %p12_p3 = scmp.ge.s32.totalorder %s835_s15, 4   ;;  %s967_s9 = smov %s782_s10 }
 0x113   : > { %s968_s10 = smov %s786_s11  ;;  %s969_s11 = smov %s846_s18 }
 0x114   : > { %s970_s12 = smov %s835_s15  ;;  %14 = sbr.rel (!%p12_p3) target bundleno = 3 (0x3), region = 63 }
 0x11b   :  { %474 = vsyncpa [#allocation3], 1 }
 0x11c   :  { %476 = vsyncpa [#allocation3 + $0x1], 1 }

</bundles_post_ra>
